<compile_context>
chip_gen: v5e
topology: v5e:2x2
jax: 0.10.0
libtpu: 0.0.40
codegen_flags: <defaults>
</compile_context>

<pallas_src>
import functools
import math

import jax
import jax.numpy as jnp
from jax import lax
from jax.experimental import pallas as pl
from jax.experimental.pallas import tpu as pltpu


def _pick_tile(dim, target, align):
    """Largest legal tile <= target that exactly divides `dim`.

    If dim <= target the full dim is used (always a legal block size).
    Otherwise search multiples of `align` (8 for sublane dims, 128 for lane
    dims); fall back to the full dim if no divisor is found.
    """
    if dim <= target:
        return dim
    t = (target // align) * align
    while t >= align:
        if dim % t == 0:
            return t
        t -= align
    return dim


# ---------------------------------------------------------------------------
# Kernel 1: tiled linear projection  y = x @ Wt + b   (Wt already (in, out))
# ---------------------------------------------------------------------------
def _linear_kernel(x_ref, wt_ref, b_ref, o_ref, acc_ref, *, cdt):
    k = pl.program_id(2)

    @pl.when(k == 0)
    def _init():
        acc_ref[...] = jnp.zeros_like(acc_ref)

    # bf16 MXU operands, f32 accumulation. Weight is pre-transposed -> no w.T.
    acc_ref[...] += jnp.dot(x_ref[...].astype(cdt), wt_ref[...],
                            preferred_element_type=jnp.float32)

    @pl.when(k == pl.num_programs(2) - 1)
    def _finalize():
        o_ref[...] = (acc_ref[...] + b_ref[...]).astype(o_ref.dtype)


def linear_proj(x2d, wt, bias, *, out_dtype, tm_target=256, tn_target=256,
                tk_target=512):
    """x2d: (M, K) f32, wt: (K, N) pre-transposed (compute dtype), bias: (N,)."""
    M, K = x2d.shape
    K2, N = wt.shape
    assert K == K2
    tm = _pick_tile(M, tm_target, 8)
    tn = _pick_tile(N, tn_target, 128)
    tk = _pick_tile(K, tk_target, 128)
    b2d = bias.reshape(1, N).astype(jnp.float32)

    kernel = functools.partial(_linear_kernel, cdt=wt.dtype)
    return pl.pallas_call(
        kernel,
        out_shape=jax.ShapeDtypeStruct((M, N), out_dtype),
        grid=(M // tm, N // tn, K // tk),
        in_specs=[
            pl.BlockSpec((tm, tk), lambda i, j, k: (i, k)),
            pl.BlockSpec((tk, tn), lambda i, j, k: (k, j)),
            pl.BlockSpec((1, tn), lambda i, j, k: (0, j)),
        ],
        out_specs=pl.BlockSpec((tm, tn), lambda i, j, k: (i, j)),
        scratch_shapes=[pltpu.VMEM((tm, tn), jnp.float32)],
        compiler_params=pltpu.CompilerParams(
            dimension_semantics=("parallel", "parallel", "arbitrary")),
    )(x2d, wt, b2d)


# ---------------------------------------------------------------------------
# Kernel 2: scaled dot-product attention.
# One (batch, T-tile) per program; all heads processed inside the kernel so
# q/k/v can stay in (B, L, E) layout (no XLA head transpose) and the outputs
# are written directly in (B, H, T, Dh) / (B, H, T, S) layout.
# ---------------------------------------------------------------------------
def _mha_kernel(q_ref, k_ref, v_ref, o_ref, w_ref, *, num_heads, head_dim,
                scale, cdt):
    q = q_ref[0]          # (tq, E)  compute dtype (bf16)
    k = k_ref[0]          # (S,  E)
    v = v_ref[0]          # (S,  E)

    for h in range(num_heads):                     # static unroll over heads
        lo = h * head_dim
        hi = lo + head_dim
        q_h = q[:, lo:hi] * scale                  # fold scale into q (tq, Dh)
        k_h = k[:, lo:hi]                          # (S, Dh)
        v_h = v[:, lo:hi]                          # (S, Dh)

        # scores: contract head dims directly (q @ k^T without materializing k.T)
        s = lax.dot_general(q_h, k_h, (((1,), (1,)), ((), ())),
                            preferred_element_type=jnp.float32)   # (tq, S) f32

        # numerically-stable softmax in f32
        m = jnp.max(s, axis=-1, keepdims=True)
        p = jnp.exp(s - m)
        denom = jnp.sum(p, axis=-1, keepdims=True)
        inv = pl.reciprocal(denom, approx=True)    # EUP, frees VALU slots

        w_ref[0, h] = (p * inv).astype(w_ref.dtype)
        o_h = jnp.dot(p.astype(cdt), v_h,
                      preferred_element_type=jnp.float32) * inv   # (tq, Dh) f32
        o_ref[0, h] = o_h.astype(o_ref.dtype)


def mha_attention(q, k, v, *, num_heads, out_dtype=jnp.float32, tq_target=128):
    """q: (B, T, E), k/v: (B, S, E) in compute dtype (e.g. bf16).

    Returns (attn_output (B,H,T,Dh), attn_weights (B,H,T,S)) in out_dtype.
    """
    B, T, E = q.shape
    S = k.shape[1]
    H = num_heads
    Dh = E // H
    scale = 1.0 / math.sqrt(Dh)                    # PyTorch: sqrt(head_dim)
    tq = _pick_tile(T, tq_target, 8)

    kernel = functools.partial(_mha_kernel, num_heads=H, head_dim=Dh,
                               scale=scale, cdt=q.dtype)
    return pl.pallas_call(
        kernel,
        out_shape=(
            jax.ShapeDtypeStruct((B, H, T, Dh), out_dtype),
            jax.ShapeDtypeStruct((B, H, T, S), out_dtype),
        ),
        grid=(B, T // tq),
        in_specs=[
            pl.BlockSpec((1, tq, E), lambda b, t: (b, t, 0)),
            # K/V index maps ignore the T axis -> not re-fetched across T tiles.
            pl.BlockSpec((1, S, E), lambda b, t: (b, 0, 0)),
            pl.BlockSpec((1, S, E), lambda b, t: (b, 0, 0)),
        ],
        out_specs=(
            pl.BlockSpec((1, H, tq, Dh), lambda b, t: (b, 0, t, 0)),
            pl.BlockSpec((1, H, tq, S), lambda b, t: (b, 0, t, 0)),
        ),
        compiler_params=pltpu.CompilerParams(
            dimension_semantics=("parallel", "parallel")),
    )(q, k, v)


# ---------------------------------------------------------------------------
# Parameter init (matches nn.Linear + xavier_uniform_, q bias=0, kv_bias=False)
# ---------------------------------------------------------------------------
def _xavier_uniform(key, shape):
    fan_out, fan_in = shape
    bound = math.sqrt(6.0 / (fan_in + fan_out))
    return jax.random.uniform(key, shape, jnp.float32, -bound, bound)


class MultiheadAttentionPallas:
    def __init__(self, embed_dim, num_heads, key, compute_dtype=jnp.bfloat16):
        assert embed_dim % num_heads == 0
        self.embed_dim = embed_dim
        self.num_heads = num_heads
        self.head_dim = embed_dim // num_heads
        self.compute_dtype = compute_dtype
        kq, kk, kv = jax.random.split(key, 3)
        wq = _xavier_uniform(kq, (embed_dim, embed_dim))   # torch (out, in) layout
        wk = _xavier_uniform(kk, (embed_dim, embed_dim))
        wv = _xavier_uniform(kv, (embed_dim, embed_dim))
        # Store pre-transposed (in, out) and fused along the output dim, in the
        # MXU compute dtype (bf16): no in-kernel transpose, half the HBM bytes.
        self.wqkv_t = jnp.concatenate([wq.T, wk.T, wv.T], axis=1).astype(compute_dtype)
        # q bias init to 0.0; k/v projections have no bias (kv_bias=False).
        self.bqkv = jnp.zeros((3 * embed_dim,), jnp.float32)

    def __call__(self, query, key, value):
        B, T, E = query.shape
        S = key.shape[1]
        cdt = self.compute_dtype

        if (query is key) and (query is value):
            # Self-attention fast path: one fused QKV GEMM (activation read once).
            qkv = linear_proj(query.reshape(B * T, E), self.wqkv_t, self.bqkv,
                              out_dtype=cdt)                         # (B*T, 3E)
            q2d, k2d, v2d = qkv[:, :E], qkv[:, E:2 * E], qkv[:, 2 * E:]
        else:
            q2d = linear_proj(query.reshape(B * T, E), self.wqkv_t[:, :E],
                              self.bqkv[:E], out_dtype=cdt)
            k2d = linear_proj(key.reshape(B * S, E), self.wqkv_t[:, E:2 * E],
                              self.bqkv[E:2 * E], out_dtype=cdt)
            v2d = linear_proj(value.reshape(B * S, E), self.wqkv_t[:, 2 * E:],
                              self.bqkv[2 * E:], out_dtype=cdt)

        # Pure reshapes only (no XLA transpose): heads are split inside the
        # attention kernel; outputs come back already in (B,H,T,Dh)/(B,H,T,S).
        q = q2d.reshape(B, T, E)
        k = k2d.reshape(B, S, E)
        v = v2d.reshape(B, S, E)
        return mha_attention(q, k, v, num_heads=self.num_heads)


# ---------------------------------------------------------------------------
# Pure-JAX reference (same math, same bf16 operand casts) for correctness check
# ---------------------------------------------------------------------------
def reference(mha, query, key, value):
    B, T, E = query.shape
    S = key.shape[1]
    H, Dh = mha.num_heads, mha.head_dim
    cdt = mha.compute_dtype

    def proj(x2d, wt, b):
        y = jnp.dot(x2d.astype(cdt), wt, preferred_element_type=jnp.float32) + b
        return y.astype(cdt)

    q = proj(query.reshape(B * T, E), mha.wqkv_t[:, :E], mha.bqkv[:E])
    k = proj(key.reshape(B * S, E), mha.wqkv_t[:, E:2 * E], mha.bqkv[E:2 * E])
    v = proj(value.reshape(B * S, E), mha.wqkv_t[:, 2 * E:], mha.bqkv[2 * E:])
    q = q.reshape(B, T, H, Dh).transpose(0, 2, 1, 3)
    k = k.reshape(B, S, H, Dh).transpose(0, 2, 1, 3)
    v = v.reshape(B, S, H, Dh).transpose(0, 2, 1, 3)

    scale = 1.0 / math.sqrt(Dh)
    s = jnp.einsum("bhtd,bhsd->bhts", q * scale, k,
                   preferred_element_type=jnp.float32)
    m = jnp.max(s, axis=-1, keepdims=True)
    p = jnp.exp(s - m)
    denom = jnp.sum(p, axis=-1, keepdims=True)
    w = p / denom
    o = jnp.einsum("bhts,bhsd->bhtd", p.astype(cdt), v,
                   preferred_element_type=jnp.float32) / denom
    return o, w


if __name__ == "__main__":
    B, T, S, E, H = 2, 8, 8, 32, 4

    root = jax.random.PRNGKey(0)
    k_param, k_q, k_k, k_v = jax.random.split(root, 4)

    mha = MultiheadAttentionPallas(E, H, k_param)

    query = jax.random.normal(k_q, (B, T, E), jnp.float32)
    key = jax.random.normal(k_k, (B, S, E), jnp.float32)
    value = jax.random.normal(k_v, (B, S, E), jnp.float32)

    # Cross-attention path (three separate projection GEMMs).
    attn_out, attn_w = mha(query, key, value)
    jax.block_until_ready(attn_out)
    jax.block_until_ready(attn_w)

    ref_out, ref_w = reference(mha, query, key, value)
    assert attn_out.shape == (B, H, T, E // H)
    assert attn_w.shape == (B, H, T, S)
    assert jnp.allclose(attn_out, ref_out, atol=5e-3, rtol=5e-3), \
        float(jnp.max(jnp.abs(attn_out - ref_out)))
    assert jnp.allclose(attn_w, ref_w, atol=5e-3, rtol=5e-3), \
        float(jnp.max(jnp.abs(attn_w - ref_w)))

    # Self-attention fast path (single fused QKV GEMM).
    sa_out, sa_w = mha(query, query, query)
    jax.block_until_ready(sa_out)
    ref_sa_out, ref_sa_w = reference(mha, query, query, query)
    assert jnp.allclose(sa_out, ref_sa_out, atol=5e-3, rtol=5e-3)
    assert jnp.allclose(sa_w, ref_sa_w, atol=5e-3, rtol=5e-3)

    print("KERNEL_OK")
</pallas_src>

<mosaic_0001>
module attributes {stable_mosaic.version = 11 : i64} {
  func.func @_linear_kernel(%arg0: i32, %arg1: i32, %arg2: i32, %arg3: memref<16x32xf32, #tpu.memory_space<vmem>>, %arg4: memref<32x32xbf16, #tpu.memory_space<vmem>>, %arg5: memref<1x32xf32, #tpu.memory_space<vmem>>, %arg6: memref<16x32xbf16, #tpu.memory_space<vmem>>, %arg7: memref<16x32xf32, #tpu.memory_space<vmem>>) attributes {dimension_semantics = [#tpu.dimension_semantics<parallel>, #tpu.dimension_semantics<parallel>, #tpu.dimension_semantics<arbitrary>], iteration_bounds = array<i64: 1, 1, 1>, scalar_prefetch = 0 : i64, scratch_operands = 1 : i64, tpu.core_type = #tpu.core_type<tc>, window_params = [{transform_indices = @transform_0, window_bounds = array<i64: 16, 32>}, {transform_indices = @transform_1, window_bounds = array<i64: 32, 32>}, {transform_indices = @transform_2, window_bounds = array<i64: 1, 32>}, {transform_indices = @transform_3, window_bounds = array<i64: 16, 32>}]} {
    %c0_i32 = arith.constant 0 : i32
    %0 = arith.cmpi eq, %arg2, %c0_i32 : i32
    %1 = arith.extui %0 : i1 to i32
    %c0_i32_0 = arith.constant 0 : i32
    %2 = arith.cmpi ne, %1, %c0_i32_0 : i32
    scf.if %2 {
      %cst_10 = arith.constant 0.000000e+00 : f32
      %13 = vector.broadcast %cst_10 : f32 to vector<16x32xf32>
      %c0_11 = arith.constant 0 : index
      %c0_12 = arith.constant 0 : index
      %14 = vector.load %arg7[%c0_11, %c0_12] : memref<16x32xf32, #tpu.memory_space<vmem>>, vector<16x32xf32>
      tpu.vector_store %arg7[%c0_11, %c0_12], %13 {strides = array<i32>} : memref<16x32xf32, #tpu.memory_space<vmem>>, vector<16x32xf32>,
    } else {
    }
    %c0 = arith.constant 0 : index
    %c0_1 = arith.constant 0 : index
    %3 = vector.load %arg7[%c0, %c0_1] : memref<16x32xf32, #tpu.memory_space<vmem>>, vector<16x32xf32>
    %c0_2 = arith.constant 0 : index
    %c0_3 = arith.constant 0 : index
    %4 = vector.load %arg3[%c0_2, %c0_3] : memref<16x32xf32, #tpu.memory_space<vmem>>, vector<16x32xf32>
    %5 = arith.truncf %4 : vector<16x32xf32> to vector<16x32xbf16>
    %c0_4 = arith.constant 0 : index
    %c0_5 = arith.constant 0 : index
    %6 = vector.load %arg4[%c0_4, %c0_5] : memref<32x32xbf16, #tpu.memory_space<vmem>>, vector<32x32xbf16>
    %cst = arith.constant dense<0.000000e+00> : vector<16x32xf32>
    %7 = tpu.matmul %5, %6, %cst {dimension_numbers = #tpu.dot_dimension_numbers<[1], [0], [0], [1], [0, 0, 1, 1], [], []>} : vector<16x32xbf16>, vector<32x32xbf16>, vector<16x32xf32> -> vector<16x32xf32>
    %8 = arith.addf %3, %7 : vector<16x32xf32>
    %c0_6 = arith.constant 0 : index
    %c0_7 = arith.constant 0 : index
    %9 = vector.load %arg7[%c0_6, %c0_7] : memref<16x32xf32, #tpu.memory_space<vmem>>, vector<16x32xf32>
    tpu.vector_store %arg7[%c0_6, %c0_7], %8 {strides = array<i32>} : memref<16x32xf32, #tpu.memory_space<vmem>>, vector<16x32xf32>,
    %c0_i32_8 = arith.constant 0 : i32
    %10 = arith.cmpi eq, %arg2, %c0_i32_8 : i32
    %11 = arith.extui %10 : i1 to i32
    %c0_i32_9 = arith.constant 0 : i32
    %12 = arith.cmpi ne, %11, %c0_i32_9 : i32
    scf.if %12 {
      %c0_10 = arith.constant 0 : index
      %c0_11 = arith.constant 0 : index
      %13 = vector.load %arg7[%c0_10, %c0_11] : memref<16x32xf32, #tpu.memory_space<vmem>>, vector<16x32xf32>
      %c0_12 = arith.constant 0 : index
      %c0_13 = arith.constant 0 : index
      %14 = vector.load %arg5[%c0_12, %c0_13] : memref<1x32xf32, #tpu.memory_space<vmem>>, vector<1x32xf32>
      %15 = vector.broadcast %14 : vector<1x32xf32> to vector<16x32xf32>
      %16 = arith.addf %13, %15 : vector<16x32xf32>
      %17 = arith.truncf %16 : vector<16x32xf32> to vector<16x32xbf16>
      %c0_14 = arith.constant 0 : index
      %c0_15 = arith.constant 0 : index
      %18 = vector.load %arg6[%c0_14, %c0_15] : memref<16x32xbf16, #tpu.memory_space<vmem>>, vector<16x32xbf16>
      tpu.vector_store %arg6[%c0_14, %c0_15], %17 {strides = array<i32>} : memref<16x32xbf16, #tpu.memory_space<vmem>>, vector<16x32xbf16>,
    } else {
    }
    return
  }
  func.func @transform_0(%arg0: i32, %arg1: i32, %arg2: i32) -> (i32, i32) {
    %c0_i32 = arith.constant 0 : i32
    return %arg0, %arg2 : i32, i32
  }
  func.func @transform_1(%arg0: i32, %arg1: i32, %arg2: i32) -> (i32, i32) {
    %c0_i32 = arith.constant 0 : i32
    return %arg2, %arg1 : i32, i32
  }
  func.func @transform_2(%arg0: i32, %arg1: i32, %arg2: i32) -> (i32, i32) {
    %c0_i32 = arith.constant 0 : i32
    %c0_i32_0 = arith.constant 0 : i32
    return %c0_i32, %arg1 : i32, i32
  }
  func.func @transform_3(%arg0: i32, %arg1: i32, %arg2: i32) -> (i32, i32) {
    %c0_i32 = arith.constant 0 : i32
    return %arg0, %arg1 : i32, i32
  }
}

</mosaic_0001>

<bundles_post_ra>
// kernel: tpu_custom_call.1
= control target key start
LH: loop header
LB: loop body
LE: loop exit
PB: predicated region body
PF: predicated region fallthrough
CT: control target
= control target key end

     0   :  { %8 = vsyncpa [#allocation4], 0  ;;  %s283_s0 = inlined_call_operand.hbm [shape: f32[16,32], index: 0, kind: input, shape index: {}]   ;;  %s284_s1 = inlined_call_operand.hbm [shape: bf16[32,32], index: 1, kind: input, shape index: {}]   ;;  %s285_s2 = inlined_call_operand.vmem [shape: f32[1,32], index: 2, kind: input, shape index: {}]   ;;  %s286_s3 = inlined_call_operand.hbm [shape: bf16[16,32], index: 3, kind: output, shape index: {}]  }
   0x1   :  { %9 = vsyncpa [#allocation7], 0 }
   0x2   :  { %10 = vsyncpa [#allocation5], 0  ;;  %s15_s14 = sshll.u32 %s283_s0, 4  ;;  %s232_s15 = smov [#allocation3]   ;;  %s16_s14 = int_to_ptr.hbm [resolvable:$true] %s15_s14 }
   0x3   :  { %s17_s16 = sshll.u32 %s232_s15, 4  ;;  %s28_s19 = sshll.u32 %s284_s1, 4  ;;  %s18_s16 = int_to_ptr.vmem [resolvable:$true] %s17_s16  ;;  %s29_s19 = int_to_ptr.hbm [resolvable:$true] %s28_s19 }
   0x4   :  { %s233_s20 = smov 128   ;;  %s234_s21 = smov 8  }
   0x5   :  { %23 = dma.hbm_to_vmem [thread:$0]  %s16_s14, 256, %s18_s16, [#allocation4], %s233_s20, %s233_s20, %s234_s21  }
   0x6   :  { %s235_s22 = smov [#allocation6]   ;;  %s236_s24 = smov 64  }
   0x7   :  { %s30_s23 = sshll.u32 %s235_s22, 4  ;;  %s237_s25 = smov 4   ;;  %s31_s23 = int_to_ptr.vmem [resolvable:$true] %s30_s23 }
   0x8   :  { %36 = dma.hbm_to_vmem [thread:$0]  %s29_s19, 256, %s31_s23, [#allocation7], %s236_s24, %s236_s24, %s237_s25  }
   0x9   :  { %226 = dma.done.wait [#allocation4], 256  }
   0xa   :  { %227 = vsyncadd [#allocation4], 4294967040 }
   0xb   :  { %228 = dma.done.wait [#allocation7], 256  }
   0xc   :  { %229 = vsyncadd [#allocation7], 4294967040  ;;  %vm52_vm0 = vcmask 261120   ;;  %v238_v0 = vmov 0.0   ;;  %v144_v1 = vld [vmem:[#allocation6 + $0x8] sm:$0xff]  ;;  %v143_v2 = vld [vmem:[#allocation6] sm:$0xff] }
   0xd   :  { %53 = vst.msk [vmem:[#allocation2] sm:$0xff] %vm52_vm0, %v238_v0  ;;  %86 = vmatpush.bf16.msra.mxu0 %v144_v1  ;;  %v57_v3 = vld [vmem:[#allocation3] sm:$0xff]  ;;  %v58_v4 = vld [vmem:[#allocation3 + $0x8] sm:$0xff]  ;;  %v153_v10 = vld [vmem:[%s285_s2] ss:$0 sm:$0xff]  ;;  %vm111_vm1 = vcmask 257024  }
   0xe   :  { %54 = vst.msk [vmem:[#allocation2 + $0x8] sm:$0xff] %vm52_vm0, %v238_v0  ;;  %v59_v5 = vpack.c.bf16 %v58_v4, %v57_v3  ;;  %s239_s26 = smov [#allocation8]   ;;  %s120_s30 = sshll.u32 %s286_s3, 4  ;;  %s121_s30 = int_to_ptr.hbm [resolvable:$true] %s120_s30 }
   0xf   :  { %s118_s27 = sshll.u32 %s239_s26, 4  ;;  %s119_s27 = int_to_ptr.vmem [resolvable:$true] %s118_s27 }
  0x11   :  { %87 = vmatpush.bf16.msra.mxu0 %v143_v2 }
  0x14   :  { %142 = vmatmul.msk.bf16.vlgmr.msra.gmra.mxu0 %vm52_vm0, %v59_v5  ;;  %v55_v6 = vld [vmem:[#allocation2] sm:$0xff] }
  0x15   :  { %v56_v9 = vld [vmem:[#allocation2 + $0x8] sm:$0xff] }
  0x91   :  { %v89_v7 = vpop.f32.mrf.mxu0 }
  0x92   :  { %v94_v8 = vadd.f32 %v89_v7, %v55_v6 }
  0x94   :  { %96 = vst.msk [vmem:[#allocation2] sm:$0xff] %vm52_vm0, %v94_v8 }
  0x99   :  { %v91_v11 = vpop.f32.mrf.mxu0 }
  0x9a   :  { %v95_v12 = vadd.f32 %v91_v11, %v56_v9 }
  0x9b   :  { %v101_v13 = vld [vmem:[#allocation2] sm:$0xff] }
  0x9c   :  { %97 = vst.msk [vmem:[#allocation2 + $0x8] sm:$0xff] %vm52_vm0, %v95_v12  ;;  %v107_v14 = vadd.f32 %v153_v10, %v101_v13 }
  0x9e   :  { %v109_v15 = vpack.c.bf16 %v107_v14, %v107_v14 }
  0xa0   :  { %112 = vst.msk [vmem:[#allocation8] sm:$0xf] %vm111_vm1, %v109_v15 }
  0xa3   :  { %v102_v16 = vld [vmem:[#allocation2 + $0x8] sm:$0xff] }
  0xa4   :  { %v108_v17 = vadd.f32 %v153_v10, %v102_v16 }
  0xa6   :  { %v110_v18 = vpack.c.bf16 %v108_v17, %v108_v17 }
  0xa8   :  { %113 = vst.msk [vmem:[#allocation8 + $0x4] sm:$0xf] %vm111_vm1, %v110_v18 }
  0xa9   :  { %126 = dma.vmem_to_hbm [thread:$0]  %s119_s27, 128, %s121_s30, [#allocation5], %s236_s24, %s236_s24, %s237_s25  }
  0xaa   :  { %230 = dma.done.wait [#allocation5], 128  }
  0xab   :  { %231 = vsyncadd [#allocation5], 4294967168 }
  0xac   :  { %131 = vsyncpa [#allocation4], 1 }
  0xad   :  { %132 = vsyncpa [#allocation7], 1 }
  0xae   :  { %133 = vsyncpa [#allocation5], 1 }

</bundles_post_ra>
